<compile_context>
chip_gen: v7x
topology: tpu7x:2x2x1
jax: 0.10.0
libtpu: 0.0.40
codegen_flags: <defaults>
</compile_context>

<pallas_src>
import string

import jax
import jax.numpy as jnp
from jax import lax
from jax.experimental import pallas as pl
from jax.experimental.pallas import tpu as pltpu


def encoder_kernel(tok_ref, twih_ref, whh_ref, b_ref, wlin_ref, blin_ref,
                   out_ref):
    """Fused one-hot gather+input-proj, LSTM recurrence (i,f,g,o), Linear.

    tok_ref  : (L, 1)    int32 token ids (assumed in [0, V); pad rows of the
                         folded table are zero, so OOB ids would silently
                         yield zero gates_x — ids are trusted here)
    twih_ref : (Vp, 4H)  (embedding @ W_ih^T), vocab zero-padded to Vp
    whh_ref  : (H, 4H)   hidden->gates weights (transposed torch weight_hh)
    b_ref    : (1, 4H)   bias_ih + bias_hh
    wlin_ref : (H, H)    linear weight (transposed torch weight)
    blin_ref : (1, H)    linear bias
    out_ref  : (L, H)    linear(h_t) for every step
    """
    L, H = out_ref.shape
    Vp = twih_ref.shape[0]

    # ---- Fused gather + input projection: one lane-dense MXU matmul -------
    tok = tok_ref[...]                                              # (L, 1)
    onehot = (lax.broadcasted_iota(jnp.int32, (L, Vp), 1) == tok
              ).astype(jnp.float32)                                 # (L, Vp)
    gates_x = (jnp.dot(onehot, twih_ref[...],
                       preferred_element_type=jnp.float32)
               + b_ref[...])                                        # (L, 4H)

    whh = whh_ref[...]                                              # (H, 4H) invariant

    h = jnp.zeros((1, H), jnp.float32)
    c = jnp.zeros((1, H), jnp.float32)
    hs = []

    # ---- Fully unrolled recurrence; h/c and collected rows live in vregs --
    for t in range(L):
        gates = gates_x[t:t + 1, :] + jnp.dot(
            h, whh, preferred_element_type=jnp.float32)             # (1, 4H)
        sig = jax.nn.sigmoid(gates)      # one EUP pass over the whole vreg
        th = jnp.tanh(gates)             # one EUP pass over the whole vreg
        i_g = sig[:, 0 * H:1 * H]
        f_g = sig[:, 1 * H:2 * H]
        g_g = th[:, 2 * H:3 * H]
        o_g = sig[:, 3 * H:4 * H]
        c = f_g * c + i_g * g_g
        h = o_g * jnp.tanh(c)
        hs.append(h)

    # ---- Deferred output Linear: one matmul + single dense store ----------
    h_all = jnp.concatenate(hs, axis=0)                             # (L, H)
    out_ref[...] = (jnp.dot(h_all, wlin_ref[...],
                            preferred_element_type=jnp.float32)
                    + blin_ref[...]).astype(out_ref.dtype)


def encoder_forward(tokens, params):
    """tokens: int32 (L,) ; returns (L, 1, H) matching the PyTorch module."""
    L = tokens.shape[0]
    H = params["w_hh_t"].shape[0]

    out = pl.pallas_call(
        encoder_kernel,
        out_shape=jax.ShapeDtypeStruct((L, H), jnp.float32),
        in_specs=[pl.BlockSpec(memory_space=pltpu.MemorySpace.VMEM)] * 6,
        out_specs=pl.BlockSpec(memory_space=pltpu.MemorySpace.VMEM),
    )(
        tokens.reshape(L, 1).astype(jnp.int32),
        params["table_wih_pad"],
        params["w_hh_t"],
        params["bias_gates"],
        params["w_lin_t"],
        params["b_lin"],
    )
    return out.reshape(L, 1, H)


def init_params(key, vocab_size, embed_size, hidden_size):
    """Deterministic synthetic init mirroring the torch module's shapes."""
    ks = jax.random.split(key, 8)
    bound = 1.0 / jnp.sqrt(hidden_size)
    u = lambda k, shape, b: jax.random.uniform(k, shape, jnp.float32, -b, b)

    embedding = jax.random.normal(ks[0], (vocab_size, embed_size), jnp.float32)
    # torch LSTM params: weight_ih (4H, E), weight_hh (4H, H), bias_ih/hh (4H,)
    w_ih = u(ks[1], (4 * hidden_size, embed_size), bound)
    w_hh = u(ks[2], (4 * hidden_size, hidden_size), bound)
    b_ih = u(ks[3], (4 * hidden_size,), bound)
    b_hh = u(ks[4], (4 * hidden_size,), bound)
    # torch Linear: weight (H, H), bias (H,)
    w_lin = u(ks[5], (hidden_size, hidden_size), bound)
    b_lin = u(ks[6], (hidden_size,), bound)

    # Fold embedding @ W_ih^T once (exact: a one-hot row of the folded table
    # equals emb[tok] @ W_ih^T) and zero-pad vocab to a multiple of 8 so the
    # MXU reduction axis is sublane-aligned.
    w_ih_t = w_ih.T                                      # (E, 4H)
    table_wih = embedding @ w_ih_t                       # (V, 4H)
    v_pad = (-vocab_size) % 8
    table_wih_pad = jnp.pad(table_wih, ((0, v_pad), (0, 0)))

    return {
        "embedding": embedding,
        "w_ih_t": w_ih_t,                                # (E, 4H)  (reference)
        "table_wih_pad": table_wih_pad,                  # (Vp, 4H) (kernel)
        "w_hh_t": w_hh.T,                                # (H, 4H)
        "bias_gates": (b_ih + b_hh).reshape(1, -1),      # (1, 4H)
        "w_lin_t": w_lin.T,                              # (H, H)
        "b_lin": b_lin.reshape(1, -1),                   # (1, H)
    }


def reference_forward(tokens, params):
    """Pure-JAX reference of the same embedding + LSTM + Linear."""
    emb = params["embedding"][tokens]
    H = params["w_hh_t"].shape[0]
    h = jnp.zeros((1, H), jnp.float32)
    c = jnp.zeros((1, H), jnp.float32)
    outs = []
    for t in range(emb.shape[0]):
        x_t = emb[t:t + 1]
        gates = (x_t @ params["w_ih_t"] + h @ params["w_hh_t"]
                 + params["bias_gates"])
        i_g = jax.nn.sigmoid(gates[:, 0 * H:1 * H])
        f_g = jax.nn.sigmoid(gates[:, 1 * H:2 * H])
        g_g = jnp.tanh(gates[:, 2 * H:3 * H])
        o_g = jax.nn.sigmoid(gates[:, 3 * H:4 * H])
        c = f_g * c + i_g * g_g
        h = o_g * jnp.tanh(c)
        outs.append(h @ params["w_lin_t"] + params["b_lin"])
    return jnp.stack(outs, axis=0)                       # (L, 1, H)


if __name__ == "__main__":
    # Vocab: 26 uppercase letters + 10 digits + '{' special = 37 tokens.
    vocab_size = len(string.ascii_uppercase) + len(string.digits) + 1
    embed_size = 32
    hidden_size = 32
    seq_len = 8

    key = jax.random.PRNGKey(0)
    k_par, k_tok = jax.random.split(key)
    params = init_params(k_par, vocab_size, embed_size, hidden_size)
    tokens = jax.random.randint(k_tok, (seq_len,), 0, vocab_size, jnp.int32)

    out = encoder_forward(tokens, params)
    out = jax.block_until_ready(out)

    ref = reference_forward(tokens, params)
    assert out.shape == (seq_len, 1, hidden_size), out.shape
    assert jnp.allclose(out, ref, atol=1e-5, rtol=1e-5), (
        float(jnp.max(jnp.abs(out - ref))))

    print("KERNEL_OK")
</pallas_src>

<mosaic_0001>
module attributes {stable_mosaic.version = 11 : i64} {
  func.func @encoder_kernel(%arg0: memref<8x1xi32, #tpu.memory_space<vmem>>, %arg1: memref<40x128xf32, #tpu.memory_space<vmem>>, %arg2: memref<32x128xf32, #tpu.memory_space<vmem>>, %arg3: memref<1x128xf32, #tpu.memory_space<vmem>>, %arg4: memref<32x32xf32, #tpu.memory_space<vmem>>, %arg5: memref<1x32xf32, #tpu.memory_space<vmem>>, %arg6: memref<8x32xf32, #tpu.memory_space<vmem>>) attributes {dimension_semantics = [], scalar_prefetch = 0 : i64, scratch_operands = 0 : i64, tpu.core_type = #tpu.core_type<tc>} {
    %c0 = arith.constant 0 : index
    %c0_0 = arith.constant 0 : index
    %0 = vector.load %arg0[%c0, %c0_0] : memref<8x1xi32, #tpu.memory_space<vmem>>, vector<8x1xi32>
    %1 = tpu.iota {dimensions = array<i32: 1>} : vector<8x40xi32>
    %2 = vector.broadcast %0 : vector<8x1xi32> to vector<8x40xi32>
    %3 = arith.cmpi eq, %1, %2 : vector<8x40xi32>
    %4 = arith.extui %3 : vector<8x40xi1> to vector<8x40xi32>
    %5 = arith.sitofp %4 : vector<8x40xi32> to vector<8x40xf32>
    %c0_1 = arith.constant 0 : index
    %c0_2 = arith.constant 0 : index
    %6 = vector.load %arg1[%c0_1, %c0_2] : memref<40x128xf32, #tpu.memory_space<vmem>>, vector<40x128xf32>
    %cst = arith.constant dense<0.000000e+00> : vector<8x128xf32>
    %7 = tpu.matmul %5, %6, %cst {dimension_numbers = #tpu.dot_dimension_numbers<[1], [0], [0], [1], [0, 0, 1, 1], [], []>} : vector<8x40xf32>, vector<40x128xf32>, vector<8x128xf32> -> vector<8x128xf32>
    %c0_3 = arith.constant 0 : index
    %c0_4 = arith.constant 0 : index
    %8 = vector.load %arg3[%c0_3, %c0_4] : memref<1x128xf32, #tpu.memory_space<vmem>>, vector<1x128xf32>
    %9 = vector.broadcast %8 : vector<1x128xf32> to vector<8x128xf32>
    %10 = arith.addf %7, %9 : vector<8x128xf32>
    %c0_5 = arith.constant 0 : index
    %c0_6 = arith.constant 0 : index
    %11 = vector.load %arg2[%c0_5, %c0_6] : memref<32x128xf32, #tpu.memory_space<vmem>>, vector<32x128xf32>
    %cst_7 = arith.constant 0.000000e+00 : f32
    %12 = vector.broadcast %cst_7 : f32 to vector<1x32xf32>
    %cst_8 = arith.constant 0.000000e+00 : f32
    %13 = vector.broadcast %cst_8 : f32 to vector<1x32xf32>
    %14 = vector.extract_strided_slice %10 {offsets = [0, 0], sizes = [1, 128], strides = [1, 1]} : vector<8x128xf32> to vector<1x128xf32>
    %cst_9 = arith.constant dense<0.000000e+00> : vector<1x128xf32>
    %15 = tpu.matmul %12, %11, %cst_9 {dimension_numbers = #tpu.dot_dimension_numbers<[1], [0], [0], [1], [0, 0, 1, 1], [], []>} : vector<1x32xf32>, vector<32x128xf32>, vector<1x128xf32> -> vector<1x128xf32>
    %16 = arith.addf %14, %15 : vector<1x128xf32>
    %17 = arith.negf %16 : vector<1x128xf32>
    %18 = math.exp %17 : vector<1x128xf32>
    %cst_10 = arith.constant 1.000000e+00 : f32
    %19 = vector.broadcast %cst_10 : f32 to vector<1x128xf32>
    %20 = arith.addf %19, %18 : vector<1x128xf32>
    %21 = arith.divf %19, %20 : vector<1x128xf32>
    %22 = math.tanh %16 : vector<1x128xf32>
    %23 = vector.extract_strided_slice %21 {offsets = [0, 0], sizes = [1, 32], strides = [1, 1]} : vector<1x128xf32> to vector<1x32xf32>
    %24 = vector.extract_strided_slice %21 {offsets = [0, 32], sizes = [1, 32], strides = [1, 1]} : vector<1x128xf32> to vector<1x32xf32>
    %25 = vector.extract_strided_slice %22 {offsets = [0, 64], sizes = [1, 32], strides = [1, 1]} : vector<1x128xf32> to vector<1x32xf32>
    %26 = vector.extract_strided_slice %21 {offsets = [0, 96], sizes = [1, 32], strides = [1, 1]} : vector<1x128xf32> to vector<1x32xf32>
    %27 = arith.mulf %24, %13 : vector<1x32xf32>
    %28 = arith.mulf %23, %25 : vector<1x32xf32>
    %29 = arith.addf %27, %28 : vector<1x32xf32>
    %30 = math.tanh %29 : vector<1x32xf32>
    %31 = arith.mulf %26, %30 : vector<1x32xf32>
    %32 = vector.extract_strided_slice %10 {offsets = [1, 0], sizes = [1, 128], strides = [1, 1]} : vector<8x128xf32> to vector<1x128xf32>
    %cst_11 = arith.constant dense<0.000000e+00> : vector<1x128xf32>
    %33 = tpu.matmul %31, %11, %cst_11 {dimension_numbers = #tpu.dot_dimension_numbers<[1], [0], [0], [1], [0, 0, 1, 1], [], []>} : vector<1x32xf32>, vector<32x128xf32>, vector<1x128xf32> -> vector<1x128xf32>
    %34 = arith.addf %32, %33 : vector<1x128xf32>
    %35 = arith.negf %34 : vector<1x128xf32>
    %36 = math.exp %35 : vector<1x128xf32>
    %cst_12 = arith.constant 1.000000e+00 : f32
    %37 = vector.broadcast %cst_12 : f32 to vector<1x128xf32>
    %38 = arith.addf %37, %36 : vector<1x128xf32>
    %39 = arith.divf %37, %38 : vector<1x128xf32>
    %40 = math.tanh %34 : vector<1x128xf32>
    %41 = vector.extract_strided_slice %39 {offsets = [0, 0], sizes = [1, 32], strides = [1, 1]} : vector<1x128xf32> to vector<1x32xf32>
    %42 = vector.extract_strided_slice %39 {offsets = [0, 32], sizes = [1, 32], strides = [1, 1]} : vector<1x128xf32> to vector<1x32xf32>
    %43 = vector.extract_strided_slice %40 {offsets = [0, 64], sizes = [1, 32], strides = [1, 1]} : vector<1x128xf32> to vector<1x32xf32>
    %44 = vector.extract_strided_slice %39 {offsets = [0, 96], sizes = [1, 32], strides = [1, 1]} : vector<1x128xf32> to vector<1x32xf32>
    %45 = arith.mulf %42, %29 : vector<1x32xf32>
    %46 = arith.mulf %41, %43 : vector<1x32xf32>
    %47 = arith.addf %45, %46 : vector<1x32xf32>
    %48 = math.tanh %47 : vector<1x32xf32>
    %49 = arith.mulf %44, %48 : vector<1x32xf32>
    %50 = vector.extract_strided_slice %10 {offsets = [2, 0], sizes = [1, 128], strides = [1, 1]} : vector<8x128xf32> to vector<1x128xf32>
    %cst_13 = arith.constant dense<0.000000e+00> : vector<1x128xf32>
    %51 = tpu.matmul %49, %11, %cst_13 {dimension_numbers = #tpu.dot_dimension_numbers<[1], [0], [0], [1], [0, 0, 1, 1], [], []>} : vector<1x32xf32>, vector<32x128xf32>, vector<1x128xf32> -> vector<1x128xf32>
    %52 = arith.addf %50, %51 : vector<1x128xf32>
    %53 = arith.negf %52 : vector<1x128xf32>
    %54 = math.exp %53 : vector<1x128xf32>
    %cst_14 = arith.constant 1.000000e+00 : f32
    %55 = vector.broadcast %cst_14 : f32 to vector<1x128xf32>
    %56 = arith.addf %55, %54 : vector<1x128xf32>
    %57 = arith.divf %55, %56 : vector<1x128xf32>
    %58 = math.tanh %52 : vector<1x128xf32>
    %59 = vector.extract_strided_slice %57 {offsets = [0, 0], sizes = [1, 32], strides = [1, 1]} : vector<1x128xf32> to vector<1x32xf32>
    %60 = vector.extract_strided_slice %57 {offsets = [0, 32], sizes = [1, 32], strides = [1, 1]} : vector<1x128xf32> to vector<1x32xf32>
    %61 = vector.extract_strided_slice %58 {offsets = [0, 64], sizes = [1, 32], strides = [1, 1]} : vector<1x128xf32> to vector<1x32xf32>
    %62 = vector.extract_strided_slice %57 {offsets = [0, 96], sizes = [1, 32], strides = [1, 1]} : vector<1x128xf32> to vector<1x32xf32>
    %63 = arith.mulf %60, %47 : vector<1x32xf32>
    %64 = arith.mulf %59, %61 : vector<1x32xf32>
    %65 = arith.addf %63, %64 : vector<1x32xf32>
    %66 = math.tanh %65 : vector<1x32xf32>
    %67 = arith.mulf %62, %66 : vector<1x32xf32>
    %68 = vector.extract_strided_slice %10 {offsets = [3, 0], sizes = [1, 128], strides = [1, 1]} : vector<8x128xf32> to vector<1x128xf32>
    %cst_15 = arith.constant dense<0.000000e+00> : vector<1x128xf32>
    %69 = tpu.matmul %67, %11, %cst_15 {dimension_numbers = #tpu.dot_dimension_numbers<[1], [0], [0], [1], [0, 0, 1, 1], [], []>} : vector<1x32xf32>, vector<32x128xf32>, vector<1x128xf32> -> vector<1x128xf32>
    %70 = arith.addf %68, %69 : vector<1x128xf32>
    %71 = arith.negf %70 : vector<1x128xf32>
    %72 = math.exp %71 : vector<1x128xf32>
    %cst_16 = arith.constant 1.000000e+00 : f32
    %73 = vector.broadcast %cst_16 : f32 to vector<1x128xf32>
    %74 = arith.addf %73, %72 : vector<1x128xf32>
    %75 = arith.divf %73, %74 : vector<1x128xf32>
    %76 = math.tanh %70 : vector<1x128xf32>
    %77 = vector.extract_strided_slice %75 {offsets = [0, 0], sizes = [1, 32], strides = [1, 1]} : vector<1x128xf32> to vector<1x32xf32>
    %78 = vector.extract_strided_slice %75 {offsets = [0, 32], sizes = [1, 32], strides = [1, 1]} : vector<1x128xf32> to vector<1x32xf32>
    %79 = vector.extract_strided_slice %76 {offsets = [0, 64], sizes = [1, 32], strides = [1, 1]} : vector<1x128xf32> to vector<1x32xf32>
    %80 = vector.extract_strided_slice %75 {offsets = [0, 96], sizes = [1, 32], strides = [1, 1]} : vector<1x128xf32> to vector<1x32xf32>
    %81 = arith.mulf %78, %65 : vector<1x32xf32>
    %82 = arith.mulf %77, %79 : vector<1x32xf32>
    %83 = arith.addf %81, %82 : vector<1x32xf32>
    %84 = math.tanh %83 : vector<1x32xf32>
    %85 = arith.mulf %80, %84 : vector<1x32xf32>
    %86 = vector.extract_strided_slice %10 {offsets = [4, 0], sizes = [1, 128], strides = [1, 1]} : vector<8x128xf32> to vector<1x128xf32>
    %cst_17 = arith.constant dense<0.000000e+00> : vector<1x128xf32>
    %87 = tpu.matmul %85, %11, %cst_17 {dimension_numbers = #tpu.dot_dimension_numbers<[1], [0], [0], [1], [0, 0, 1, 1], [], []>} : vector<1x32xf32>, vector<32x128xf32>, vector<1x128xf32> -> vector<1x128xf32>
    %88 = arith.addf %86, %87 : vector<1x128xf32>
    %89 = arith.negf %88 : vector<1x128xf32>
    %90 = math.exp %89 : vector<1x128xf32>
    %cst_18 = arith.constant 1.000000e+00 : f32
    %91 = vector.broadcast %cst_18 : f32 to vector<1x128xf32>
    %92 = arith.addf %91, %90 : vector<1x128xf32>
    %93 = arith.divf %91, %92 : vector<1x128xf32>
    %94 = math.tanh %88 : vector<1x128xf32>
    %95 = vector.extract_strided_slice %93 {offsets = [0, 0], sizes = [1, 32], strides = [1, 1]} : vector<1x128xf32> to vector<1x32xf32>
    %96 = vector.extract_strided_slice %93 {offsets = [0, 32], sizes = [1, 32], strides = [1, 1]} : vector<1x128xf32> to vector<1x32xf32>
    %97 = vector.extract_strided_slice %94 {offsets = [0, 64], sizes = [1, 32], strides = [1, 1]} : vector<1x128xf32> to vector<1x32xf32>
    %98 = vector.extract_strided_slice %93 {offsets = [0, 96], sizes = [1, 32], strides = [1, 1]} : vector<1x128xf32> to vector<1x32xf32>
    %99 = arith.mulf %96, %83 : vector<1x32xf32>
    %100 = arith.mulf %95, %97 : vector<1x32xf32>
    %101 = arith.addf %99, %100 : vector<1x32xf32>
    %102 = math.tanh %101 : vector<1x32xf32>
    %103 = arith.mulf %98, %102 : vector<1x32xf32>
    %104 = vector.extract_strided_slice %10 {offsets = [5, 0], sizes = [1, 128], strides = [1, 1]} : vector<8x128xf32> to vector<1x128xf32>
    %cst_19 = arith.constant dense<0.000000e+00> : vector<1x128xf32>
    %105 = tpu.matmul %103, %11, %cst_19 {dimension_numbers = #tpu.dot_dimension_numbers<[1], [0], [0], [1], [0, 0, 1, 1], [], []>} : vector<1x32xf32>, vector<32x128xf32>, vector<1x128xf32> -> vector<1x128xf32>
    %106 = arith.addf %104, %105 : vector<1x128xf32>
    %107 = arith.negf %106 : vector<1x128xf32>
    %108 = math.exp %107 : vector<1x128xf32>
    %cst_20 = arith.constant 1.000000e+00 : f32
    %109 = vector.broadcast %cst_20 : f32 to vector<1x128xf32>
    %110 = arith.addf %109, %108 : vector<1x128xf32>
    %111 = arith.divf %109, %110 : vector<1x128xf32>
    %112 = math.tanh %106 : vector<1x128xf32>
    %113 = vector.extract_strided_slice %111 {offsets = [0, 0], sizes = [1, 32], strides = [1, 1]} : vector<1x128xf32> to vector<1x32xf32>
    %114 = vector.extract_strided_slice %111 {offsets = [0, 32], sizes = [1, 32], strides = [1, 1]} : vector<1x128xf32> to vector<1x32xf32>
    %115 = vector.extract_strided_slice %112 {offsets = [0, 64], sizes = [1, 32], strides = [1, 1]} : vector<1x128xf32> to vector<1x32xf32>
    %116 = vector.extract_strided_slice %111 {offsets = [0, 96], sizes = [1, 32], strides = [1, 1]} : vector<1x128xf32> to vector<1x32xf32>
    %117 = arith.mulf %114, %101 : vector<1x32xf32>
    %118 = arith.mulf %113, %115 : vector<1x32xf32>
    %119 = arith.addf %117, %118 : vector<1x32xf32>
    %120 = math.tanh %119 : vector<1x32xf32>
    %121 = arith.mulf %116, %120 : vector<1x32xf32>
    %122 = vector.extract_strided_slice %10 {offsets = [6, 0], sizes = [1, 128], strides = [1, 1]} : vector<8x128xf32> to vector<1x128xf32>
    %cst_21 = arith.constant dense<0.000000e+00> : vector<1x128xf32>
    %123 = tpu.matmul %121, %11, %cst_21 {dimension_numbers = #tpu.dot_dimension_numbers<[1], [0], [0], [1], [0, 0, 1, 1], [], []>} : vector<1x32xf32>, vector<32x128xf32>, vector<1x128xf32> -> vector<1x128xf32>
    %124 = arith.addf %122, %123 : vector<1x128xf32>
    %125 = arith.negf %124 : vector<1x128xf32>
    %126 = math.exp %125 : vector<1x128xf32>
    %cst_22 = arith.constant 1.000000e+00 : f32
    %127 = vector.broadcast %cst_22 : f32 to vector<1x128xf32>
    %128 = arith.addf %127, %126 : vector<1x128xf32>
    %129 = arith.divf %127, %128 : vector<1x128xf32>
    %130 = math.tanh %124 : vector<1x128xf32>
    %131 = vector.extract_strided_slice %129 {offsets = [0, 0], sizes = [1, 32], strides = [1, 1]} : vector<1x128xf32> to vector<1x32xf32>
    %132 = vector.extract_strided_slice %129 {offsets = [0, 32], sizes = [1, 32], strides = [1, 1]} : vector<1x128xf32> to vector<1x32xf32>
    %133 = vector.extract_strided_slice %130 {offsets = [0, 64], sizes = [1, 32], strides = [1, 1]} : vector<1x128xf32> to vector<1x32xf32>
    %134 = vector.extract_strided_slice %129 {offsets = [0, 96], sizes = [1, 32], strides = [1, 1]} : vector<1x128xf32> to vector<1x32xf32>
    %135 = arith.mulf %132, %119 : vector<1x32xf32>
    %136 = arith.mulf %131, %133 : vector<1x32xf32>
    %137 = arith.addf %135, %136 : vector<1x32xf32>
    %138 = math.tanh %137 : vector<1x32xf32>
    %139 = arith.mulf %134, %138 : vector<1x32xf32>
    %140 = vector.extract_strided_slice %10 {offsets = [7, 0], sizes = [1, 128], strides = [1, 1]} : vector<8x128xf32> to vector<1x128xf32>
    %cst_23 = arith.constant dense<0.000000e+00> : vector<1x128xf32>
    %141 = tpu.matmul %139, %11, %cst_23 {dimension_numbers = #tpu.dot_dimension_numbers<[1], [0], [0], [1], [0, 0, 1, 1], [], []>} : vector<1x32xf32>, vector<32x128xf32>, vector<1x128xf32> -> vector<1x128xf32>
    %142 = arith.addf %140, %141 : vector<1x128xf32>
    %143 = arith.negf %142 : vector<1x128xf32>
    %144 = math.exp %143 : vector<1x128xf32>
    %cst_24 = arith.constant 1.000000e+00 : f32
    %145 = vector.broadcast %cst_24 : f32 to vector<1x128xf32>
    %146 = arith.addf %145, %144 : vector<1x128xf32>
    %147 = arith.divf %145, %146 : vector<1x128xf32>
    %148 = math.tanh %142 : vector<1x128xf32>
    %149 = vector.extract_strided_slice %147 {offsets = [0, 0], sizes = [1, 32], strides = [1, 1]} : vector<1x128xf32> to vector<1x32xf32>
    %150 = vector.extract_strided_slice %147 {offsets = [0, 32], sizes = [1, 32], strides = [1, 1]} : vector<1x128xf32> to vector<1x32xf32>
    %151 = vector.extract_strided_slice %148 {offsets = [0, 64], sizes = [1, 32], strides = [1, 1]} : vector<1x128xf32> to vector<1x32xf32>
    %152 = vector.extract_strided_slice %147 {offsets = [0, 96], sizes = [1, 32], strides = [1, 1]} : vector<1x128xf32> to vector<1x32xf32>
    %153 = arith.mulf %150, %137 : vector<1x32xf32>
    %154 = arith.mulf %149, %151 : vector<1x32xf32>
    %155 = arith.addf %153, %154 : vector<1x32xf32>
    %156 = math.tanh %155 : vector<1x32xf32>
    %157 = arith.mulf %152, %156 : vector<1x32xf32>
    %158 = tpu.concatenate %31, %49, %67, %85, %103, %121, %139, %157 in 0 : vector<1x32xf32>, vector<1x32xf32>, vector<1x32xf32>, vector<1x32xf32>, vector<1x32xf32>, vector<1x32xf32>, vector<1x32xf32>, vector<1x32xf32> -> vector<8x32xf32>
    %c0_25 = arith.constant 0 : index
    %c0_26 = arith.constant 0 : index
    %159 = vector.load %arg4[%c0_25, %c0_26] : memref<32x32xf32, #tpu.memory_space<vmem>>, vector<32x32xf32>
    %cst_27 = arith.constant dense<0.000000e+00> : vector<8x32xf32>
    %160 = tpu.matmul %158, %159, %cst_27 {dimension_numbers = #tpu.dot_dimension_numbers<[1], [0], [0], [1], [0, 0, 1, 1], [], []>} : vector<8x32xf32>, vector<32x32xf32>, vector<8x32xf32> -> vector<8x32xf32>
    %c0_28 = arith.constant 0 : index
    %c0_29 = arith.constant 0 : index
    %161 = vector.load %arg5[%c0_28, %c0_29] : memref<1x32xf32, #tpu.memory_space<vmem>>, vector<1x32xf32>
    %162 = vector.broadcast %161 : vector<1x32xf32> to vector<8x32xf32>
    %163 = arith.addf %160, %162 : vector<8x32xf32>
    %c0_30 = arith.constant 0 : index
    %c0_31 = arith.constant 0 : index
    %164 = vector.load %arg6[%c0_30, %c0_31] : memref<8x32xf32, #tpu.memory_space<vmem>>, vector<8x32xf32>
    tpu.vector_store %arg6[%c0_30, %c0_31], %163 {strides = array<i32>} : memref<8x32xf32, #tpu.memory_space<vmem>>, vector<8x32xf32>,
    return
  }
}

</mosaic_0001>

<bundles_post_ra>
// kernel: tpu_custom_call.1
= control target key start
LH: loop header
LB: loop body
LE: loop exit
PB: predicated region body
PF: predicated region fallthrough
CT: control target
= control target key end

     0   :  { %11 = vsyncpa [#allocation3], 0  ;;  %s1780_s0 = inlined_call_operand.vmem [shape: s32[8,1], index: 0, kind: input, shape index: {}]   ;;  %s1781_s1 = inlined_call_operand.hbm [shape: f32[40,128], index: 1, kind: input, shape index: {}]   ;;  %s1782_s2 = inlined_call_operand.hbm [shape: f32[32,128], index: 2, kind: input, shape index: {}]   ;;  %s1783_s3 = inlined_call_operand.vmem [shape: f32[1,128], index: 3, kind: input, shape index: {}]   ;;  %s1784_s4 = inlined_call_operand.hbm [shape: f32[32,32], index: 4, kind: input, shape index: {}]   ;;  %s1785_s5 = inlined_call_operand.vmem [shape: f32[1,32], index: 5, kind: input, shape index: {}]   ;;  %s1786_s6 = inlined_call_operand.hbm [shape: f32[8,32], index: 6, kind: output, shape index: {}]  }
   0x1   :  { %12 = vsyncpa [#allocation6], 0 }
   0x2   :  { %13 = vsyncpa [#allocation4], 0  ;;  %s1542_s21 = smov [#allocation5]   ;;  %s1543_s23 = smov [#allocation2]  }
   0x3   :  { %s33_s22 = sshll.u32 %s1542_s21, 4  ;;  %s21_s24 = sshll.u32 %s1543_s23, 4  ;;  %s34_s22 = int_to_ptr.vmem [resolvable:$true] %s33_s22  ;;  %s1589_s24 = int_to_ptr.vmem [resolvable:$true] %s21_s24 }
   0x4   :  { %s1448_s27 = scalar_lea.hbm %s1782_s2, 512 }
   0x5   :  { %p1449_p0 = scmp.ne.s32.totalorder %s1782_s2, %s1448_s27  ;;  %p1452_p1 = scmp.lt.u32.totalorder %s1448_s27, %s1782_s2 }
   0x7   :  { %p1454_p2 = pnand %p1452_p1, %p1449_p0 }
   0x9   :  { %1457 = shalt.err (!%p1454_p2)
}
   0xa   :  { %s1458_s8 = scalar_lea.vmem %s34_s22, 512  ;;  %p1463_p4 = scmp.lt.s32.totalorder %s34_s22, %s34_s22 }
   0xb   :  { %p1459_p3 = scmp.ne.s32.totalorder %s34_s22, %s1458_s8  ;;  %p1464_p5 = scmp.lt.s32.totalorder %s1458_s8, %s1458_s8 }
   0xd   :  { %p1465_p6 = por %p1464_p5, %p1463_p4 }
   0xf   :  { %p1466_p7 = pnand %p1465_p6, %p1459_p3 }
  0x11   :  { %1469 = shalt.err (!%p1466_p7)
}
  0x12   :  { %s1544_s9 = smov 128   ;;  %s1545_s10 = smov 8  }
  0x13   :  { %39 = dma.hbm_to_vmem [thread:$0]  %s1782_s2, 512, %s34_s22, [#allocation6], %s1544_s9, %s1544_s9, %s1545_s10  }
  0x14   :  { %s1470_s15 = scalar_lea.hbm %s1781_s1, 640 }
  0x15   :  { %p1471_p8 = scmp.ne.s32.totalorder %s1781_s1, %s1470_s15  ;;  %p1474_p9 = scmp.lt.u32.totalorder %s1470_s15, %s1781_s1 }
  0x17   :  { %p1476_p10 = pnand %p1474_p9, %p1471_p8 }
  0x19   :  { %1479 = shalt.err (!%p1476_p10)
}
  0x1a   :  { %s1480_s20 = scalar_lea.vmem %s1589_s24, 640  ;;  %p1485_p12 = scmp.lt.s32.totalorder %s1589_s24, %s1589_s24 }
  0x1b   :  { %p1481_p11 = scmp.ne.s32.totalorder %s1589_s24, %s1480_s20  ;;  %p1486_p13 = scmp.lt.s32.totalorder %s1480_s20, %s1480_s20 }
  0x1d   :  { %p1487_p0 = por %p1486_p13, %p1485_p12 }
  0x1f   :  { %p1488_p1 = pnand %p1487_p0, %p1481_p11 }
  0x21   :  { %1491 = shalt.err (!%p1488_p1)
}
  0x22   :  { %27 = dma.hbm_to_vmem [thread:$0]  %s1781_s1, 640, %s1589_s24, [#allocation3], %s1544_s9, %s1544_s9, %s1545_s10  }
  0x23   :  { %s1546_s22 = smov [#allocation7]   ;;  %s1492_s27 = scalar_lea.hbm %s1784_s4, 512 }
  0x24   :  { %s47_s23 = sshll.u32 %s1546_s22, 4  ;;  %p1493_p2 = scmp.ne.s32.totalorder %s1784_s4, %s1492_s27  ;;  %s48_s23 = int_to_ptr.vmem [resolvable:$true] %s47_s23 }
  0x25   :  { %p1496_p3 = scmp.lt.u32.totalorder %s1492_s27, %s1784_s4 }
  0x27   :  { %p1498_p4 = pnand %p1496_p3, %p1493_p2 }
  0x29   :  { %1501 = shalt.err (!%p1498_p4)
}
  0x2a   :  { %s1502_s8 = scalar_lea.vmem %s48_s23, 512  ;;  %p1507_p6 = scmp.lt.s32.totalorder %s48_s23, %s48_s23 }
  0x2b   :  { %p1503_p5 = scmp.ne.s32.totalorder %s48_s23, %s1502_s8  ;;  %p1508_p7 = scmp.lt.s32.totalorder %s1502_s8, %s1502_s8 }
  0x2d   :  { %p1509_p8 = por %p1508_p7, %p1507_p6 }
  0x2f   :  { %p1510_p9 = pnand %p1509_p8, %p1503_p5 }
  0x31   :  { %1513 = shalt.err (!%p1510_p9)
}
  0x32   :  { %53 = dma.hbm_to_vmem [thread:$0]  %s1784_s4, 512, %s48_s23, [#allocation6], %s1544_s9, %s1544_s9, %s1545_s10  }
  0x33   :  { %1536 = dma.done.wait [#allocation3], 640  }
  0x34   :  { %1537 = vsyncadd [#allocation3], 4294966656 }
  0x35   :  { %1538 = dma.done.wait [#allocation6], 1024  }
  0x36   :  { %1539 = vsyncadd [#allocation6], 4294966272  ;;  %v1547_v0 = vmov 0   ;;  %v1548_v1 = vmov 0.0|0.0   ;;  %v65_v2 = vld [vmem:[%s1780_s0] sm:$0xff]  ;;  %v75_v4 = vld [vmem:[#allocation2 + $0x8] sm:$0xff]  ;;  %v66_v17 = vlaneseq }
  0x37   :  { %1383 = vset.pattern.permute.xlu0 %v1547_v0  ;;  %1311 = vmatprep.subr.bf16.mxu0 %v1548_v1  ;;  %v74_v3 = vld [vmem:[#allocation2] sm:$0xff]  ;;  %v160_v6 = vld [vmem:[#allocation5] sm:$0xff]  ;;  %v161_v7 = vld [vmem:[#allocation5 + $0x8] sm:$0xff]  ;;  %vm1549_vm0 = vmmov 0   ;;  %v1550_v13 = vmov 0.0   ;;  %vm86_vm1 = vcmask 326656  }
  0x38   :  { %1317 = vmatprep.subr.bf16.mxu1 %v1548_v1  ;;  %69 = vperm.xlu0 %1383, %v65_v2   ;;  %v1312_v5 = vpack.c.bf16 %v75_v4, %v74_v3  ;;  %v76_v8 = vld [vmem:[#allocation2 + $0x10] sm:$0xff]  ;;  %v1646_v9 = vpack.c.bf16 %v161_v7, %v160_v6  ;;  %v77_v10 = vld [vmem:[#allocation2 + $0x18] sm:$0xff]  ;;  %v163_v12 = vld [vmem:[#allocation5 + $0x18] sm:$0xff]  ;;  %v67_v18 = vand.u32 127, %v66_v17  ;;  %s1551_s9 = smov 64   ;;  %vm164_vm3 = vcmask 261120  }
  0x39   :  { %v162_v11 = vld [vmem:[#allocation5 + $0x10] sm:$0xff]  ;;  %1209 = vmatprep.mubr.msk.f32.mxu0 %vm1549_vm0, %v1550_v13  ;;  %1220 = vmatprep.mubr.msk.f32.mxu1 %vm1549_vm0, %v1550_v13  ;;  %v1315_v14 = vpack.c.bf16 %v77_v10, %v76_v8  ;;  %v78_v16 = vld [vmem:[#allocation2 + $0x20] sm:$0xff]  ;;  %vm1011_vm4 = vcmask 1040384   ;;  %vm1013_vm5 = vcmask 1041408   ;;  %vm1015_vm6 = vcmask 1042432   ;;  %s1553_s14 = smov [#allocation8]  }
  0x3a   :  { %1313 = vmatpush3.bf16.msra.mxu0 %v1312_v5  ;;  %1319 = vmatpush3.bf16.msra.mxu1 %v1646_v9  ;;  %v1654_v15 = vpack.c.bf16 %v163_v12, %v162_v11  ;;  %v1129_v23 = vld [vmem:[%s1783_s3] ss:$0 sm:$0xff]  ;;  %s1552_s3 = smov 32   ;;  %vm1017_vm7 = vcmask 1043456   ;;  %vm1019_vm8 = vcmask 1044480   ;;  %vm1021_vm9 = vcmask 1045504  }
  0x3b   :  { %1314 = vmatprep.subr.bf16.mxu0 %v1548_v1  ;;  %1320 = vmatprep.subr.bf16.mxu1 %v1548_v1  ;;  %vm1023_vm10 = vcmask 1046528   ;;  %s1118_s15 = sshll.u32 %s1553_s14, 4  ;;  %s1119_s15 = int_to_ptr.vmem [resolvable:$true] %s1118_s15 }
  0x3c   :  { %s1514_s16 = scalar_lea.vmem %s1119_s15, 128  ;;  %p1519_p11 = scmp.lt.s32.totalorder %s1119_s15, %s1119_s15 }
  0x3d   :  { %p1515_p10 = scmp.ne.s32.totalorder %s1119_s15, %s1514_s16  ;;  %p1520_p12 = scmp.lt.s32.totalorder %s1514_s16, %s1514_s16 }
  0x3e   :  { %1316 = vmatpush3.bf16.msra.mxu0 %v1315_v14  ;;  %1322 = vmatpush3.bf16.msra.mxu1 %v1654_v15 }
  0x3f   :  { %1207 = vmatprep.subr.mxu0 %v1550_v13  ;;  %1323 = vmatprep.subr.bf16.mxu1 %v1548_v1  ;;  %p1521_p13 = por %p1520_p12, %p1519_p11 }
  0x41   :  { %1221 = vmatmul.mubr.f32.vlgmr.msra.gmra.mrb[0].mxu1 %v1550_v13  ;;  %p1522_p0 = pnand %p1521_p13, %p1515_p10 }
  0x42   :  { %1208 = vmatpush3.msra.mxu0 %v78_v16  ;;  %1325 = vmatpush3.bf16.msra.mxu1 %v1646_v9 }
  0x43   :  { %1231 = vmatprep.mubr.msk.f32.mxu1 %vm1549_vm0, %v1550_v13  ;;  %1326 = vmatprep.subr.bf16.mxu1 %v1548_v1 }
  0x44   :  { %1329 = vmatprep.subr.bf16.mxu0 %v1548_v1 }
  0x46   :  { %1328 = vmatpush3.bf16.msra.mxu1 %v1654_v15 }
  0x47   :  { %1335 = vmatprep.subr.bf16.mxu1 %v1548_v1 }
  0xb7   :  { %v70_v19 = vpop.permute.xlu0 %69 }
  0xb8   :  { %vm71_vm2 = vcmp.eq.s32.totalorder %v67_v18, %v70_v19 }
  0xb9   :  { %v1128_v20 = vsel %vm71_vm2, 1.0, %v1550_v13 }
  0xba   :  { %1210 = vmatmul.mubr.msk.f32.vlgmr.msra.gmra.mrb[0].mxu0 %vm86_vm1, %v1128_v20 }
  0xbb   :  { %1331 = vmatpush3.bf16.msra.mxu0 %v1646_v9  ;;  %1242 = vmatprep.mubr.msk.f32.mxu0 %vm1549_vm0, %v1550_v13 }
  0xbc   :  { %1332 = vmatprep.subr.bf16.mxu0 %v1548_v1 }
  0xbf   :  { %1334 = vmatpush3.bf16.msra.mxu0 %v1654_v15 }
  0xc0   :  { %1341 = vmatprep.subr.bf16.mxu0 %v1548_v1 }
 0x114   :  { %v234_v21 = vpop.f32.mrb[0].mxu1 }
 0x115   :  { %v1222_v22 = vpop.f32.mrb[1].mxu1 }
 0x18d   :  { %v156_v24 = vpop.f32.mrb[0].mxu0 }
 0x18e   :  { %v1678_v25 = vadd.f32 %v1129_v23, %v156_v24  ;;  %v1211_v26 = vpop.f32.mrb[1].mxu0 }
 0x190   :  { %v238_v27 = vadd.f32 %v234_v21, %v1678_v25 }
 0x192   :  { %1384 = vtanh.f32 %v238_v27  ;;  %v1131_v29 = vmul.f32 -1.442695, %v238_v27 }
 0x194   :  { %1386 = vpow2.f32 %v1131_v29 }
 0x19c   :  { %v1385_v28 = vpop.eup %1384 }
 0x19d   :  { %248 = vrot.lane.b32.xlu0 %v1385_v28, %s1551_s9 }
 0x19e   :  { %v1387_v30 = vpop.eup %1386 }
 0x19f   :  { %v242_v31 = vadd.f32 1.0, %v1387_v30 }
 0x1a1   :  { %1388 = vrcp.f32 %v242_v31 }
 0x1ab   :  { %v1389_v32 = vpop.eup %1388 }
 0x1ac   :  { %v246_v35 = vmul.f32 0.0, %v1389_v32 }
 0x20f   :  { %v249_v33 = vpop.permute.xlu0 %248 }
 0x210   :  { %v251_v34 = vmul.f32 %v1389_v32, %v249_v33 }
 0x212   :  { %253 = vrot.lane.b32.xlu1 %v251_v34, %s1552_s3 }
 0x284   :  { %v254_v36 = vpop.permute.xlu1 %253 }
 0x285   :  { %v256_v37 = vadd.f32 %v254_v36, %v246_v35 }
 0x287   :  { %1390 = vtanh.f32 %v256_v37  ;;  %v350_v53 = vrot.slane %v256_v37, 7 }
 0x291   :  { %v1391_v38 = vpop.eup %1390 }
 0x292   :  { %259 = vrot.lane.b32.xlu1 %v1391_v38, %s1551_s9 }
 0x304   :  { %v260_v39 = vpop.permute.xlu1 %259 }
 0x305   :  { %v1684_v40 = vmul.f32 %v1389_v32, %v260_v39 }
 0x307   :  { %264 = vrot.lane.b32.xlu0 %v1684_v40, %s1552_s3 }
 0x379   :  { %v265_v41 = vpop.permute.xlu0 %264 }
 0x37a   :  { %1232 = vmatmul.mubr.msk.f32.vlgmr.msra.gmra.mrb[2].mxu1 %vm164_vm3, %v265_v41 }
 0x37b   :  { %1337 = vmatpush3.bf16.msra.mxu1 %v1646_v9  ;;  %1253 = vmatprep.mubr.msk.f32.mxu1 %vm1549_vm0, %v1550_v13 }
 0x37c   :  { %1338 = vmatprep.subr.bf16.mxu1 %v1548_v1 }
 0x37f   :  { %1340 = vmatpush3.bf16.msra.mxu1 %v1654_v15 }
 0x380   :  { %1347 = vmatprep.subr.bf16.mxu1 %v1548_v1 }
 0x44d   :  { %v334_v42 = vpop.f32.mrb[2].mxu1 }
 0x44e   :  { %v339_v43 = vrot.slane %v334_v42, 7  ;;  %v1233_v44 = vpop.f32.mrb[3].mxu1 }
 0x450   :  { %v341_v45 = vadd.f32 %v339_v43, %v1678_v25 }
 0x452   :  { %1392 = vtanh.f32 %v341_v45  ;;  %v1133_v47 = vmul.f32 -1.442695, %v341_v45 }
 0x454   :  { %1394 = vpow2.f32 %v1133_v47 }
 0x45c   :  { %v1393_v46 = vpop.eup %1392 }
 0x45d   :  { %354 = vrot.lane.b32.xlu1 %v1393_v46, %s1551_s9 }
 0x45e   :  { %v1395_v48 = vpop.eup %1394 }
 0x45f   :  { %v345_v49 = vadd.f32 1.0, %v1395_v48 }
 0x461   :  { %1396 = vrcp.f32 %v345_v49 }
 0x46b   :  { %v1397_v50 = vpop.eup %1396 }
 0x46c   :  { %v352_v54 = vmul.f32 %v1397_v50, %v350_v53 }
 0x4cf   :  { %v355_v51 = vpop.permute.xlu1 %354 }
 0x4d0   :  { %v357_v52 = vmul.f32 %v1397_v50, %v355_v51 }
 0x4d2   :  { %359 = vrot.lane.b32.xlu0 %v357_v52, %s1552_s3 }
 0x544   :  { %v360_v55 = vpop.permute.xlu0 %359 }
 0x545   :  { %v362_v56 = vadd.f32 %v360_v55, %v352_v54 }
 0x547   :  { %1398 = vtanh.f32 %v362_v56  ;;  %v457_v11 = vrot.slane %v362_v56, 7 }
 0x551   :  { %v1399_v57 = vpop.eup %1398 }
 0x552   :  { %365 = vrot.lane.b32.xlu1 %v1399_v57, %s1551_s9 }
 0x5c4   :  { %v366_v58 = vpop.permute.xlu1 %365 }
 0x5c5   :  { %v368_v59 = vmul.f32 %v1397_v50, %v366_v58 }
 0x5c7   :  { %v370_v60 = vrot.slane %v368_v59, 1  ;;  %v1012_v20 = vsel %vm1011_vm4, %v1684_v40, %v368_v59 }
 0x5c9   :  { %371 = vrot.lane.b32.xlu0 %v370_v60, %s1552_s3 }
 0x63b   :  { %v372_v61 = vpop.permute.xlu0 %371 }
 0x63c   :  { %1243 = vmatmul.mubr.msk.f32.vlgmr.msra.gmra.mrb[2].mxu0 %vm164_vm3, %v372_v61 }
 0x63d   :  { %1343 = vmatpush3.bf16.msra.mxu0 %v1646_v9  ;;  %1264 = vmatprep.mubr.msk.f32.mxu0 %vm1549_vm0, %v1550_v13 }
 0x63e   :  { %1344 = vmatprep.subr.bf16.mxu0 %v1548_v1 }
 0x641   :  { %1346 = vmatpush3.bf16.msra.mxu0 %v1654_v15 }
 0x642   :  { %1353 = vmatprep.subr.bf16.mxu0 %v1548_v1 }
 0x70f   :  { %v441_v62 = vpop.f32.mrb[2].mxu0 }
 0x710   :  { %v446_v63 = vrot.slane %v441_v62, 6  ;;  %v1244_v0 = vpop.f32.mrb[3].mxu0 }
 0x712   :  { %v448_v2 = vadd.f32 %v446_v63, %v1678_v25 }
 0x714   :  { %1400 = vtanh.f32 %v448_v2  ;;  %v1135_v4 = vmul.f32 -1.442695, %v448_v2 }
 0x716   :  { %1402 = vpow2.f32 %v1135_v4 }
 0x71e   :  { %v1401_v3 = vpop.eup %1400 }
 0x71f   :  { %461 = vrot.lane.b32.xlu1 %v1401_v3, %s1551_s9 }
 0x720   :  { %v1403_v5 = vpop.eup %1402 }
 0x721   :  { %v452_v6 = vadd.f32 1.0, %v1403_v5 }
 0x723   :  { %1404 = vrcp.f32 %v452_v6 }
 0x72d   :  { %v1405_v7 = vpop.eup %1404 }
 0x72e   :  { %v459_v12 = vmul.f32 %v1405_v7, %v457_v11 }
 0x791   :  { %v462_v8 = vpop.permute.xlu1 %461 }
 0x792   :  { %v464_v10 = vmul.f32 %v1405_v7, %v462_v8 }
 0x794   :  { %466 = vrot.lane.b32.xlu0 %v464_v10, %s1552_s3 }
 0x806   :  { %v467_v14 = vpop.permute.xlu0 %466 }
 0x807   :  { %v469_v16 = vadd.f32 %v467_v14, %v459_v12 }
 0x809   :  { %1406 = vtanh.f32 %v469_v16  ;;  %v564_v36 = vrot.slane %v469_v16, 7 }
 0x813   :  { %v1407_v17 = vpop.eup %1406 }
 0x814   :  { %472 = vrot.lane.b32.xlu1 %v1407_v17, %s1551_s9 }
 0x886   :  { %v473_v18 = vpop.permute.xlu1 %472 }
 0x887   :  { %v475_v19 = vmul.f32 %v1405_v7, %v473_v18 }
 0x889   :  { %v477_v21 = vrot.slane %v475_v19, 2  ;;  %v1014_v22 = vsel %vm1013_vm5, %v1012_v20, %v475_v19 }
 0x88b   :  { %478 = vrot.lane.b32.xlu0 %v477_v21, %s1552_s3 }
 0x8fd   :  { %v479_v23 = vpop.permute.xlu0 %478 }
 0x8fe   :  { %1254 = vmatmul.mubr.msk.f32.vlgmr.msra.gmra.mrb[4].mxu1 %vm164_vm3, %v479_v23 }
 0x8ff   :  { %1349 = vmatpush3.bf16.msra.mxu1 %v1646_v9  ;;  %1275 = vmatprep.mubr.msk.f32.mxu1 %vm1549_vm0, %v1550_v13 }
 0x900   :  { %1350 = vmatprep.subr.bf16.mxu1 %v1548_v1 }
 0x903   :  { %1352 = vmatpush3.bf16.msra.mxu1 %v1654_v15 }
 0x904   :  { %1359 = vmatprep.subr.bf16.mxu1 %v1548_v1 }
 0x9d1   :  { %v548_v24 = vpop.f32.mrb[4].mxu1 }
 0x9d2   :  { %v553_v26 = vrot.slane %v548_v24, 5  ;;  %v1255_v27 = vpop.f32.mrb[5].mxu1 }
 0x9d4   :  { %v555_v28 = vadd.f32 %v553_v26, %v1678_v25 }
 0x9d6   :  { %1408 = vtanh.f32 %v555_v28  ;;  %v1137_v30 = vmul.f32 -1.442695, %v555_v28 }
 0x9d8   :  { %1410 = vpow2.f32 %v1137_v30 }
 0x9e0   :  { %v1409_v29 = vpop.eup %1408 }
 0x9e1   :  { %568 = vrot.lane.b32.xlu1 %v1409_v29, %s1551_s9 }
 0x9e2   :  { %v1411_v31 = vpop.eup %1410 }
 0x9e3   :  { %v559_v32 = vadd.f32 1.0, %v1411_v31 }
 0x9e5   :  { %1412 = vrcp.f32 %v559_v32 }
 0x9ef   :  { %v1413_v33 = vpop.eup %1412 }
 0x9f0   :  { %v566_v37 = vmul.f32 %v1413_v33, %v564_v36 }
 0xa53   :  { %v569_v34 = vpop.permute.xlu1 %568 }
 0xa54   :  { %v571_v35 = vmul.f32 %v1413_v33, %v569_v34 }
 0xa56   :  { %573 = vrot.lane.b32.xlu0 %v571_v35, %s1552_s3 }
 0xac8   :  { %v574_v38 = vpop.permute.xlu0 %573 }
 0xac9   :  { %v576_v39 = vadd.f32 %v574_v38, %v566_v37 }
 0xacb   :  { %1414 = vtanh.f32 %v576_v39  ;;  %v671_v57 = vrot.slane %v576_v39, 7 }
 0xad5   :  { %v1415_v40 = vpop.eup %1414 }
 0xad6   :  { %579 = vrot.lane.b32.xlu1 %v1415_v40, %s1551_s9 }
 0xb48   :  { %v580_v41 = vpop.permute.xlu1 %579 }
 0xb49   :  { %v582_v42 = vmul.f32 %v1413_v33, %v580_v41 }
 0xb4b   :  { %v584_v43 = vrot.slane %v582_v42, 3  ;;  %v1016_v44 = vsel %vm1015_vm6, %v1014_v22, %v582_v42 }
 0xb4d   :  { %585 = vrot.lane.b32.xlu0 %v584_v43, %s1552_s3 }
 0xbbf   :  { %v586_v45 = vpop.permute.xlu0 %585 }
 0xbc0   :  { %1265 = vmatmul.mubr.msk.f32.vlgmr.msra.gmra.mrb[4].mxu0 %vm164_vm3, %v586_v45 }
 0xbc1   :  { %1355 = vmatpush3.bf16.msra.mxu0 %v1646_v9  ;;  %1286 = vmatprep.mubr.msk.f32.mxu0 %vm1549_vm0, %v1550_v13 }
 0xbc2   :  { %1356 = vmatprep.subr.bf16.mxu0 %v1548_v1 }
 0xbc5   :  { %1358 = vmatpush3.bf16.msra.mxu0 %v1654_v15 }
 0xbc6   :  { %1365 = vmatprep.subr.bf16.mxu0 %v1548_v1 }
 0xc93   :  { %v655_v46 = vpop.f32.mrb[4].mxu0 }
 0xc94   :  { %v660_v47 = vrot.slane %v655_v46, 4  ;;  %v1266_v48 = vpop.f32.mrb[5].mxu0 }
 0xc96   :  { %v662_v49 = vadd.f32 %v660_v47, %v1678_v25 }
 0xc98   :  { %1416 = vtanh.f32 %v662_v49  ;;  %v1139_v51 = vmul.f32 -1.442695, %v662_v49 }
 0xc9a   :  { %1418 = vpow2.f32 %v1139_v51 }
 0xca2   :  { %v1417_v50 = vpop.eup %1416 }
 0xca3   :  { %675 = vrot.lane.b32.xlu1 %v1417_v50, %s1551_s9 }
 0xca4   :  { %v1419_v52 = vpop.eup %1418 }
 0xca5   :  { %v666_v53 = vadd.f32 1.0, %v1419_v52 }
 0xca7   :  { %1420 = vrcp.f32 %v666_v53 }
 0xcb1   :  { %v1421_v54 = vpop.eup %1420 }
 0xcb2   :  { %v673_v58 = vmul.f32 %v1421_v54, %v671_v57 }
 0xd15   :  { %v676_v55 = vpop.permute.xlu1 %675 }
 0xd16   :  { %v678_v56 = vmul.f32 %v1421_v54, %v676_v55 }
 0xd18   :  { %680 = vrot.lane.b32.xlu0 %v678_v56, %s1552_s3 }
 0xd8a   :  { %v681_v59 = vpop.permute.xlu0 %680 }
 0xd8b   :  { %v683_v60 = vadd.f32 %v681_v59, %v673_v58 }
 0xd8d   :  { %1422 = vtanh.f32 %v683_v60 }
 0xd97   :  { %v1423_v61 = vpop.eup %1422 }
 0xd98   :  { %686 = vrot.lane.b32.xlu1 %v1423_v61, %s1551_s9 }
 0xe0a   :  { %v687_v62 = vpop.permute.xlu1 %686 }
 0xe0b   :  { %v689_v63 = vmul.f32 %v1421_v54, %v687_v62  ;;  %v1026_v62 = vld [vmem:[#allocation7 + $0x8] sm:$0xff] }
 0xe0d   :  { %v691_v0 = vrot.slane %v689_v63, 4  ;;  %v1018_v2 = vsel %vm1017_vm7, %v1016_v44, %v689_v63  ;;  %v1027_v63 = vld [vmem:[#allocation7 + $0x10] sm:$0xff] }
 0xe0f   :  { %692 = vrot.lane.b32.xlu0 %v691_v0, %s1552_s3 }
 0xe81   :  { %v693_v3 = vpop.permute.xlu0 %692 }
 0xe82   :  { %1276 = vmatmul.mubr.msk.f32.vlgmr.msra.gmra.mrb[6].mxu1 %vm164_vm3, %v693_v3 }
 0xe83   :  { %1361 = vmatpush3.bf16.msra.mxu1 %v1646_v9  ;;  %1297 = vmatprep.mubr.msk.f32.mxu1 %vm1549_vm0, %v1550_v13 }
 0xe84   :  { %1362 = vmatprep.subr.bf16.mxu1 %v1548_v1 }
 0xe87   :  { %1364 = vmatpush3.bf16.msra.mxu1 %v1654_v15  ;;  %v778_v15 = vrot.slane %v683_v60, 7 }
 0xf55   :  { %v762_v4 = vpop.f32.mrb[6].mxu1 }
 0xf56   :  { %v767_v5 = vrot.slane %v762_v4, 3  ;;  %v1277_v6 = vpop.f32.mrb[7].mxu1 }
 0xf58   :  { %v769_v7 = vadd.f32 %v767_v5, %v1678_v25 }
 0xf5a   :  { %1424 = vtanh.f32 %v769_v7  ;;  %v1141_v10 = vmul.f32 -1.442695, %v769_v7 }
 0xf5c   :  { %1426 = vpow2.f32 %v1141_v10  ;;  %v1146_v10 = vld [vmem:[%s1785_s5] ss:$0 sm:$0xff] }
 0xf64   :  { %v1425_v8 = vpop.eup %1424 }
 0xf65   :  { %782 = vrot.lane.b32.xlu1 %v1425_v8, %s1551_s9 }
 0xf66   :  { %v1427_v11 = vpop.eup %1426 }
 0xf67   :  { %v773_v9 = vadd.f32 1.0, %v1427_v11 }
 0xf69   :  { %1428 = vrcp.f32 %v773_v9 }
 0xf73   :  { %v1429_v12 = vpop.eup %1428 }
 0xf74   :  { %v780_v17 = vmul.f32 %v1429_v12, %v778_v15 }
 0xfd7   :  { %v783_v14 = vpop.permute.xlu1 %782 }
 0xfd8   :  { %v785_v16 = vmul.f32 %v1429_v12, %v783_v14 }
 0xfda   :  { %787 = vrot.lane.b32.xlu0 %v785_v16, %s1552_s3 }
0x104c   :  { %v788_v18 = vpop.permute.xlu0 %787 }
0x104d   :  { %v790_v19 = vadd.f32 %v788_v18, %v780_v17 }
0x104f   :  { %1430 = vtanh.f32 %v790_v19 }
0x1059   :  { %v1431_v20 = vpop.eup %1430 }
0x105a   :  { %793 = vrot.lane.b32.xlu1 %v1431_v20, %s1551_s9 }
0x10cc   :  { %v794_v21 = vpop.permute.xlu1 %793 }
0x10cd   :  { %v796_v22 = vmul.f32 %v1429_v12, %v794_v21 }
0x10cf   :  { %v798_v23 = vrot.slane %v796_v22, 5  ;;  %v1020_v24 = vsel %vm1019_vm8, %v1018_v2, %v796_v22  ;;  %v1028_v2 = vld [vmem:[#allocation7 + $0x18] sm:$0xff] }
0x10d0   :  { %v1369_v3 = vpack.c.bf16 %v1028_v2, %v1027_v63 }
0x10d1   :  { %799 = vrot.lane.b32.xlu0 %v798_v23, %s1552_s3 }
0x1143   :  { %v800_v26 = vpop.permute.xlu0 %799 }
0x1144   :  { %1287 = vmatmul.mubr.msk.f32.vlgmr.msra.gmra.mrb[6].mxu0 %vm164_vm3, %v800_v26 }
0x1145   :  { %1308 = vmatprep.mubr.msk.f32.mxu0 %vm1549_vm0, %v1550_v13  ;;  %v885_v13 = vrot.slane %v790_v19, 7 }
0x1217   :  { %v869_v27 = vpop.f32.mrb[6].mxu0 }
0x1218   :  { %v874_v28 = vrot.slane %v869_v27, 2  ;;  %v1288_v29 = vpop.f32.mrb[7].mxu0 }
0x121a   :  { %v876_v30 = vadd.f32 %v874_v28, %v1678_v25 }
0x121c   :  { %1432 = vtanh.f32 %v876_v30  ;;  %v1143_v32 = vmul.f32 -1.442695, %v876_v30 }
0x121e   :  { %1434 = vpow2.f32 %v1143_v32 }
0x1226   :  { %v1433_v31 = vpop.eup %1432 }
0x1227   :  { %889 = vrot.lane.b32.xlu1 %v1433_v31, %s1551_s9 }
0x1228   :  { %v1435_v33 = vpop.eup %1434 }
0x1229   :  { %v880_v34 = vadd.f32 1.0, %v1435_v33 }
0x122b   :  { %1436 = vrcp.f32 %v880_v34 }
0x1235   :  { %v1437_v35 = vpop.eup %1436 }
0x1236   :  { %v887_v38 = vmul.f32 %v1437_v35, %v885_v13 }
0x1299   :  { %v890_v36 = vpop.permute.xlu1 %889 }
0x129a   :  { %v892_v37 = vmul.f32 %v1437_v35, %v890_v36 }
0x129c   :  { %894 = vrot.lane.b32.xlu0 %v892_v37, %s1552_s3 }
0x130e   :  { %v895_v39 = vpop.permute.xlu0 %894 }
0x130f   :  { %v897_v40 = vadd.f32 %v895_v39, %v887_v38 }
0x1311   :  { %1438 = vtanh.f32 %v897_v40  ;;  %v992_v58 = vrot.slane %v897_v40, 7 }
0x131b   :  { %v1439_v41 = vpop.eup %1438 }
0x131c   :  { %900 = vrot.lane.b32.xlu1 %v1439_v41, %s1551_s9 }
0x138e   :  { %v901_v42 = vpop.permute.xlu1 %900 }
0x138f   :  { %v903_v43 = vmul.f32 %v1437_v35, %v901_v42 }
0x1391   :  { %v905_v44 = vrot.slane %v903_v43, 6  ;;  %v1022_v45 = vsel %vm1021_vm9, %v1020_v24, %v903_v43 }
0x1393   :  { %906 = vrot.lane.b32.xlu0 %v905_v44, %s1552_s3 }
0x1405   :  { %v907_v46 = vpop.permute.xlu0 %906 }
0x1406   :  { %1298 = vmatmul.mubr.msk.f32.vlgmr.msra.gmra.mrb[8].mxu1 %vm164_vm3, %v907_v46 }
0x14d9   :  { %v976_v47 = vpop.f32.mrb[8].mxu1 }
0x14da   :  { %v981_v48 = vrot.slane %v976_v47, 1  ;;  %v1299_v49 = vpop.f32.mrb[9].mxu1 }
0x14dc   :  { %v983_v50 = vadd.f32 %v981_v48, %v1678_v25  ;;  %v1025_v25 = vld [vmem:[#allocation7] sm:$0xff] }
0x14dd   :  { %v1366_v0 = vpack.c.bf16 %v1026_v62, %v1025_v25 }
0x14de   :  { %1440 = vtanh.f32 %v983_v50  ;;  %v1145_v52 = vmul.f32 -1.442695, %v983_v50 }
0x14df   :  { %1367 = vmatpush3.bf16.msra.mxu0 %v1366_v0 }
0x14e0   :  { %1442 = vpow2.f32 %v1145_v52  ;;  %1368 = vmatprep.subr.bf16.mxu0 %v1548_v1 }
0x14e3   :  { %1370 = vmatpush3.bf16.msra.mxu0 %v1369_v3 }
0x14e8   :  { %v1441_v51 = vpop.eup %1440 }
0x14e9   :  { %996 = vrot.lane.b32.xlu1 %v1441_v51, %s1551_s9 }
0x14ea   :  { %v1443_v53 = vpop.eup %1442 }
0x14eb   :  { %v987_v54 = vadd.f32 1.0, %v1443_v53 }
0x14ed   :  { %1444 = vrcp.f32 %v987_v54 }
0x14f7   :  { %v1445_v55 = vpop.eup %1444 }
0x14f8   :  { %v994_v59 = vmul.f32 %v1445_v55, %v992_v58 }
0x155b   :  { %v997_v56 = vpop.permute.xlu1 %996 }
0x155c   :  { %v999_v57 = vmul.f32 %v1445_v55, %v997_v56 }
0x155e   :  { %1001 = vrot.lane.b32.xlu0 %v999_v57, %s1552_s3 }
0x15d0   :  { %v1002_v60 = vpop.permute.xlu0 %1001 }
0x15d1   :  { %v1004_v61 = vadd.f32 %v1002_v60, %v994_v59 }
0x15d3   :  { %1446 = vtanh.f32 %v1004_v61 }
0x15dd   :  { %v1447_v4 = vpop.eup %1446 }
0x15de   :  { %1007 = vrot.lane.b32.xlu1 %v1447_v4, %s1551_s9 }
0x1650   :  { %v1008_v5 = vpop.permute.xlu1 %1007 }
0x1651   :  { %v1010_v6 = vmul.f32 %v1445_v55, %v1008_v5 }
0x1653   :  { %v1024_v7 = vsel %vm1023_vm10, %v1022_v45, %v1010_v6 }
0x1654   :  { %1037 = vrot.lane.b32.xlu0 %v1024_v7, %s1552_s3 }
0x16c6   :  { %v1038_v8 = vpop.permute.xlu0 %1037 }
0x16c7   :  { %1309 = vmatmul.mubr.msk.f32.vlgmr.msra.gmra.mrb[8].mxu0 %vm164_vm3, %v1038_v8 }
0x179a   :  { %v1107_v1 = vpop.f32.mrb[8].mxu0 }
0x179b   :  { %v1108_v11 = vadd.f32 %v1146_v10, %v1107_v1  ;;  %v1310_v9 = vpop.f32.mrb[9].mxu0 }
0x179d   :  { %1111 = vst.msk [vmem:[#allocation8] sm:$0xff] %vm164_vm3, %v1108_v11 }
0x179e   :  { %1525 = shalt.err (!%p1522_p0)
}
0x179f   :  { %s1526_s19 = scalar_lea.hbm %s1786_s6, 128 }
0x17a0   :  { %p1527_p1 = scmp.ne.s32.totalorder %s1786_s6, %s1526_s19  ;;  %p1530_p2 = scmp.lt.u32.totalorder %s1526_s19, %s1786_s6 }
0x17a2   :  { %p1532_p3 = pnand %p1530_p2, %p1527_p1 }
0x17a4   :  { %1535 = shalt.err (!%p1532_p3)
}
0x17a5   :  { %1121 = dma.vmem_to_hbm [thread:$0]  %s1119_s15, 128, %s1786_s6, [#allocation4]  }
0x17a6   :  { %1540 = dma.done.wait [#allocation4], 128  }
0x17a7   :  { %1541 = vsyncadd [#allocation4], 4294967168 }
0x17a8   :  { %1125 = vsyncpa [#allocation3], 1 }
0x17a9   :  { %1126 = vsyncpa [#allocation6], 1 }
0x17aa   :  { %1127 = vsyncpa [#allocation4], 1 }

</bundles_post_ra>
